<compile_context>
chip_gen: v7x
topology: tpu7x:2x2x1
jax: 0.10.0
libtpu: 0.0.40
codegen_flags: <defaults>
</compile_context>

<pallas_src>
import jax
import jax.numpy as jnp
from jax.experimental import pallas as pl
from jax.experimental.pallas import tpu as pltpu

NUM_STAGES = 3
ND = [8, 4, 4]        # depth hypotheses per stage (small stand-in for [48, 24, 8])
F_CH = 8              # backbone feature channels per stage
C_IN = 3              # RGB input channels

MAX_HW_TILE = 4096            # lane-tile upper bound (multiple of 128)
VMEM_TILE_BUDGET = 24 << 20   # bytes of double-buffered blocks per grid step (fits v7x)


def _pick_hw_tile(hw, per_lane_bytes, vmem_budget=VMEM_TILE_BUDGET, max_tile=MAX_HW_TILE):
    """Largest HW tile that (a) is a multiple of 128 dividing hw, (b) fits the VMEM
    budget, (c) is <= max_tile.  Falls back to the full extent (always legal)."""
    cap = min(max_tile, max(128, vmem_budget // max(per_lane_bytes, 1)))
    cap = max(128, (cap // 128) * 128)
    if hw <= cap:
        return hw                      # full-extent block is always legal
    t = cap
    while t >= 128:
        if hw % t == 0:
            return t
        t -= 128
    return hw                          # hw not a multiple of 128: use full extent


# ----------------------------------------------------------------------------
# Pallas kernel 1: pointwise conv + ReLU  (Backbone per-stage feature extractor)
#   grid = (B*V, HW_tiles); 1x1 conv done as C broadcast FMAs on the VPU.
# ----------------------------------------------------------------------------
def pw_conv_relu_kernel(x_ref, w_ref, b_ref, o_ref):
    x = x_ref[0]                                   # (C, T) f32
    w = w_ref[...]                                 # (F, C) f32
    b = b_ref[...]                                 # (F, 1) f32
    C = x.shape[0]
    y = b + w[:, 0:1] * x[0:1, :]                  # (F, T)
    for c in range(1, C):                          # tiny static loop over channels
        y = y + w[:, c:c + 1] * x[c:c + 1, :]
    o_ref[0] = jnp.maximum(y, 0.0).astype(o_ref.dtype)


def pointwise_conv_relu(x, w, b):
    # x: (N, C, H, W) f32 -> (N, F, H, W) bf16
    N, C, H, W = x.shape
    F = w.shape[0]
    HW = H * W
    xf = x.reshape(N, C, HW)
    per_lane = 2 * (C * 4 + F * 2)                 # double-buffered f32 in + bf16 out
    tile = _pick_hw_tile(HW, per_lane)
    out = pl.pallas_call(
        pw_conv_relu_kernel,
        out_shape=jax.ShapeDtypeStruct((N, F, HW), jnp.bfloat16),
        grid=(N, HW // tile),
        in_specs=[
            pl.BlockSpec((1, C, tile), lambda n, t: (n, 0, t)),
            pl.BlockSpec((F, C), lambda n, t: (0, 0)),
            pl.BlockSpec((F, 1), lambda n, t: (0, 0)),
        ],
        out_specs=pl.BlockSpec((1, F, tile), lambda n, t: (n, 0, t)),
        compiler_params=pltpu.CompilerParams(
            dimension_semantics=("parallel", "parallel"),
            vmem_limit_bytes=32 * 1024 * 1024),
    )(xf, w, b.reshape(F, 1))
    return out.reshape(N, F, H, W)


# ----------------------------------------------------------------------------
# Pallas kernel 2: fused cost aggregation + regularization + regression
#   grid = (B, HW_tiles)
#   inputs : ref feature (1,F,T) bf16, warped src features (1, Vs*D, F, T) bf16,
#            per-pixel depth hypotheses (1, D, T) f32
#   output : packed (1, 2, T) f32  -> row 0 = depth, row 1 = confidence
#   (prob_volume is consumed in-kernel only; never written to HBM)
# ----------------------------------------------------------------------------
def cost_reg_regress_kernel(ref_ref, warp_ref, hyp_ref, out_ref):
    D = hyp_ref.shape[1]
    VsD = warp_ref.shape[1]
    Vs = VsD // D
    inv_n = 1.0 / float(Vs + 1)

    ref = ref_ref[0].astype(jnp.float32)                         # (F, T)
    sum_x = ref[None, :, :]                                      # (1, F, T)
    sum_sq = sum_x * sum_x
    for v in range(Vs):                                          # static view loop
        wv = warp_ref[0, v * D:(v + 1) * D, :, :].astype(jnp.float32)   # (D, F, T)
        sum_x = sum_x + wv
        sum_sq = sum_sq + wv * wv
    mean = sum_x * inv_n
    var = sum_sq * inv_n - mean * mean                           # variance cost volume

    # "Regular" (synthetic stand-in for the 3D-CNN): channel-mean + softmax over depth
    cost = jnp.mean(var, axis=1)                                 # (D, T)
    logits = -cost
    m = jnp.max(logits, axis=0, keepdims=True)
    e = jnp.exp(logits - m)
    inv_den = pl.reciprocal(jnp.sum(e, axis=0, keepdims=True), approx=True)
    p = e * inv_den                                              # prob volume (D, T)

    hyp = hyp_ref[0]                                             # (D, T) f32
    depth = jnp.sum(p * hyp, axis=0, keepdims=True)              # depth regression (1, T)
    conf = jnp.max(p, axis=0, keepdims=True)                     # confidence (1, T)
    out_ref[0, 0:1, :] = depth
    out_ref[0, 1:2, :] = conf


def cost_reg_regress(ref_flat, warped, hyp_flat):
    # ref_flat: (B,F,HW) bf16   warped: (B,Vs,D,F,HW) bf16   hyp_flat: (B,D,HW) f32
    B, F, HW = ref_flat.shape
    Vs, D = warped.shape[1], warped.shape[2]
    warp4 = warped.reshape(B, Vs * D, F, HW)
    per_lane = 2 * (Vs * D * F * 2        # warped block, bf16, double-buffered
                    + F * 2               # ref block, bf16
                    + D * 4               # hypothesis block, f32
                    + 2 * 4)              # packed output block, f32
    tile = _pick_hw_tile(HW, per_lane)
    out = pl.pallas_call(
        cost_reg_regress_kernel,
        out_shape=jax.ShapeDtypeStruct((B, 2, HW), jnp.float32),
        grid=(B, HW // tile),
        in_specs=[
            pl.BlockSpec((1, F, tile), lambda b, t: (b, 0, t)),
            pl.BlockSpec((1, Vs * D, F, tile), lambda b, t: (b, 0, 0, t)),
            pl.BlockSpec((1, D, tile), lambda b, t: (b, 0, t)),
        ],
        out_specs=pl.BlockSpec((1, 2, tile), lambda b, t: (b, 0, t)),
        compiler_params=pltpu.CompilerParams(
            dimension_semantics=("parallel", "parallel"),
            vmem_limit_bytes=40 * 1024 * 1024),
    )(ref_flat, warp4, hyp_flat)
    return out[:, 0], out[:, 1]          # depth (B,HW), confidence (B,HW)


# ----------------------------------------------------------------------------
# Plain-JAX glue (parameter init, scale unit, depth hypotheses, homography warp)
# ----------------------------------------------------------------------------
def init_params(key):
    ks = jax.random.split(key, 2 * NUM_STAGES)
    params = []
    for s in range(NUM_STAGES):
        w = 0.5 * jax.random.normal(ks[2 * s], (F_CH, C_IN), jnp.float32)
        b = 0.1 * jax.random.normal(ks[2 * s + 1], (F_CH,), jnp.float32)
        params.append((w, b))
    return params


def avg_pool2x2(x):
    N, C, H, W = x.shape
    return x.reshape(N, C, H // 2, 2, W // 2, 2).mean(axis=(3, 5))


def backbone_all_views(params, origin_imgs):
    # origin_imgs: (B, V, C, H, W) f32 -> list (per stage) of (B, V, F, Hs, Ws) bf16,
    # batched over views so each stage is a single pallas_call with grid (B*V, tiles).
    B, V, C, H, W = origin_imgs.shape
    x = origin_imgs.reshape(B * V, C, H, W)
    x2 = avg_pool2x2(x)
    x4 = avg_pool2x2(x2)
    pyramid = [x4, x2, x]                           # stage 0 coarsest (H/4)
    feats = []
    for s in range(NUM_STAGES):
        w, b = params[s]
        f = pointwise_conv_relu(pyramid[s], w, b)   # (B*V, F, Hs, Ws) bf16
        feats.append(f.reshape(B, V, F_CH, f.shape[2], f.shape[3]))
    return feats


def scale_unit(intrinsics, extrinsics, stage):
    # scale intrinsics to the feature resolution of this stage and build 4x4 projections
    s = 2.0 ** (stage - (NUM_STAGES - 1))          # stage 0 -> 1/4, 1 -> 1/2, 2 -> 1
    K = intrinsics.at[..., :2, :].multiply(s)      # (B, V, 3, 3)
    top = jnp.einsum('bvij,bvjk->bvik', K, extrinsics[..., :3, :4])
    proj = extrinsics.at[..., :3, :4].set(top)     # (B, V, 4, 4)
    return proj[:, 0], proj[:, 1:]                 # ref_proj, src_projs


def depth_hypos_unit(depth, depth_range, prob_volume, prev_hypos, stage, H, W):
    # mirrors Depth_hypos(depth, depth_range, prob_volume, depth_hypos, upsample=True)
    B = depth_range.shape[0]
    D = ND[stage]
    if depth is None:
        t = jnp.linspace(0.0, 1.0, D, dtype=jnp.float32)
        hyp = depth_range[:, :1] + (depth_range[:, 1:] - depth_range[:, :1]) * t[None]
        return jnp.broadcast_to(hyp[:, :, None, None], (B, D, H, W)).astype(jnp.float32)
    depth_up = jnp.repeat(jnp.repeat(depth, 2, axis=1), 2, axis=2)      # upsample=True (2x)
    interval = (depth_range[:, 1] - depth_range[:, 0]) / (ND[0] * (2 ** stage))
    offs = jnp.linspace(-(D - 1) / 2.0, (D - 1) / 2.0, D, dtype=jnp.float32)
    return depth_up[:, None] + offs[None, :, None, None] * interval[:, None, None, None]


def homo_warp(src_feat, src_proj, ref_proj, depth_hypos):
    # TODO(synk): fusing this data-dependent bilinear gather into the Pallas cost kernel
    # (src features via memory_space=pl.ANY + in-kernel gather of precomputed indices)
    # would remove the HBM round trip of the warped volume; kept in JAX for now,
    # but its output is bf16 to halve the dominant HBM stream.
    # src_feat: (B,F,H,W) bf16  src_proj/ref_proj: (B,4,4)  depth_hypos: (B,D,H,W)
    # -> (B,D,F,HW) bf16
    B, F, H, W = src_feat.shape
    D = depth_hypos.shape[1]
    proj = src_proj @ jnp.linalg.inv(ref_proj)
    rot, trans = proj[:, :3, :3], proj[:, :3, 3]
    yy, xx = jnp.meshgrid(jnp.arange(H, dtype=jnp.float32),
                          jnp.arange(W, dtype=jnp.float32), indexing='ij')
    grid = jnp.stack([xx.ravel(), yy.ravel(), jnp.ones(H * W, jnp.float32)], 0)   # (3, HW)
    rot_xyz = jnp.einsum('bij,jn->bin', rot, grid)                                # (B,3,HW)
    pts = rot_xyz[:, :, None, :] * depth_hypos.reshape(B, 1, D, H * W) \
        + trans[:, :, None, None]                                                 # (B,3,D,HW)
    z = jnp.where(jnp.abs(pts[:, 2]) < 1e-6, 1e-6, pts[:, 2])
    px, py = pts[:, 0] / z, pts[:, 1] / z                                         # (B,D,HW)

    x0, y0 = jnp.floor(px), jnp.floor(py)
    fx1, fy1 = px - x0, py - y0
    fx0, fy0 = 1.0 - fx1, 1.0 - fy1
    featf = src_feat.reshape(B, F, H * W)

    def sample(ix, iy):
        valid = ((ix >= 0) & (ix <= W - 1) & (iy >= 0) & (iy <= H - 1)).astype(jnp.float32)
        ixc = jnp.clip(ix, 0, W - 1).astype(jnp.int32)
        iyc = jnp.clip(iy, 0, H - 1).astype(jnp.int32)
        idx = iyc * W + ixc                                                       # (B,D,HW)
        g = jax.vmap(lambda f, i: f[:, i])(featf, idx).astype(jnp.float32)        # (B,F,D,HW)
        return g * valid[:, None]

    warped = (sample(x0, y0) * (fx0 * fy0)[:, None] +
              sample(x0 + 1, y0) * (fx1 * fy0)[:, None] +
              sample(x0, y0 + 1) * (fx0 * fy1)[:, None] +
              sample(x0 + 1, y0 + 1) * (fx1 * fy1)[:, None])                      # (B,F,D,HW)
    return jnp.transpose(warped, (0, 2, 1, 3)).astype(jnp.bfloat16)               # (B,D,F,HW)


# ----------------------------------------------------------------------------
# CoreNet.forward
# ----------------------------------------------------------------------------
def corenet_forward(params, origin_imgs, extrinsics, intrinsics, depth_range, training=False):
    origin_imgs = origin_imgs.astype(jnp.float32)
    B, V, C, H, W = origin_imgs.shape
    features = backbone_all_views(params, origin_imgs)      # per stage: (B, V, F, Hs, Ws)

    depth = depth_hypos = None
    prob_volume = None     # never materialized in HBM; confidence comes from the fused kernel
    confidence = None
    depths = []
    for stage in range(NUM_STAGES):
        feat_s = features[stage]                            # (B, V, F, Hs, Ws) bf16
        ref_proj, src_projs = scale_unit(intrinsics, extrinsics, stage)
        Hs, Ws = feat_s.shape[3], feat_s.shape[4]
        depth_hypos = depth_hypos_unit(depth, depth_range, prob_volume, depth_hypos,
                                       stage, Hs, Ws)
        warped = jnp.stack(
            [homo_warp(feat_s[:, v + 1], src_projs[:, v], ref_proj, depth_hypos)
             for v in range(V - 1)], axis=1)                # (B, Vs, D, F, HW) bf16
        ref_flat = feat_s[:, 0].reshape(B, F_CH, Hs * Ws)   # bf16
        hyp_flat = depth_hypos.reshape(B, -1, Hs * Ws)      # f32
        depth_flat, conf_flat = cost_reg_regress(ref_flat, warped, hyp_flat)
        depth = depth_flat.reshape(B, Hs, Ws)
        confidence = conf_flat.reshape(B, Hs, Ws)
        depths.append(depth)

    if training:
        return {'depth': depths}
    # NOTE: self.Refine is stored in __init__ but never invoked in forward(); not used here.
    return {'depth': depth, 'confidence': confidence}


if __name__ == "__main__":
    key = jax.random.PRNGKey(0)
    kimg, kp = jax.random.split(key)

    B, V, C, H, W = 1, 3, 3, 128, 128
    origin_imgs = jax.random.normal(kimg, (B, V, C, H, W), jnp.float32)

    K = jnp.array([[140.0, 0.0, W / 2.0],
                   [0.0, 140.0, H / 2.0],
                   [0.0, 0.0, 1.0]], jnp.float32)
    intrinsics = jnp.broadcast_to(K, (B, V, 3, 3))

    exts = []
    for v in range(V):
        exts.append(jnp.eye(4, dtype=jnp.float32).at[0, 3].set(20.0 * v))
    extrinsics = jnp.broadcast_to(jnp.stack(exts, 0), (B, V, 4, 4))

    depth_range = jnp.array([[425.0, 935.0]], jnp.float32)

    params = init_params(kp)
    out = corenet_forward(params, origin_imgs, extrinsics, intrinsics, depth_range,
                          training=False)
    jax.block_until_ready(out["depth"])
    jax.block_until_ready(out["confidence"])
    print("KERNEL_OK")
</pallas_src>

<mosaic_0001>
module attributes {stable_mosaic.version = 11 : i64} {
  func.func @pw_conv_relu_kernel(%arg0: i32, %arg1: i32, %arg2: memref<1x3x1024xf32, #tpu.memory_space<vmem>>, %arg3: memref<8x3xf32, #tpu.memory_space<vmem>>, %arg4: memref<8x1xf32, #tpu.memory_space<vmem>>, %arg5: memref<1x8x1024xbf16, #tpu.memory_space<vmem>>) attributes {dimension_semantics = [#tpu.dimension_semantics<parallel>, #tpu.dimension_semantics<parallel>], iteration_bounds = array<i64: 3, 1>, scalar_prefetch = 0 : i64, scratch_operands = 0 : i64, tpu.core_type = #tpu.core_type<tc>, window_params = [{transform_indices = @transform_0, window_bounds = array<i64: 1, 3, 1024>}, {pipeline_mode = #tpu.pipeline_mode<synchronous>, transform_indices = @transform_1, window_bounds = array<i64: 8, 3>}, {pipeline_mode = #tpu.pipeline_mode<synchronous>, transform_indices = @transform_2, window_bounds = array<i64: 8, 1>}, {transform_indices = @transform_3, window_bounds = array<i64: 1, 8, 1024>}]} {
    %c0 = arith.constant 0 : index
    %c0_0 = arith.constant 0 : index
    %c0_1 = arith.constant 0 : index
    %0 = vector.load %arg2[%c0, %c0_0, %c0_1] : memref<1x3x1024xf32, #tpu.memory_space<vmem>>, vector<1x3x1024xf32>
    %1 = vector.shape_cast %0 : vector<1x3x1024xf32> to vector<3x1024xf32>
    %c0_2 = arith.constant 0 : index
    %c0_3 = arith.constant 0 : index
    %2 = vector.load %arg3[%c0_2, %c0_3] : memref<8x3xf32, #tpu.memory_space<vmem>>, vector<8x3xf32>
    %c0_4 = arith.constant 0 : index
    %c0_5 = arith.constant 0 : index
    %3 = vector.load %arg4[%c0_4, %c0_5] : memref<8x1xf32, #tpu.memory_space<vmem>>, vector<8x1xf32>
    %4 = vector.extract_strided_slice %2 {offsets = [0, 0], sizes = [8, 1], strides = [1, 1]} : vector<8x3xf32> to vector<8x1xf32>
    %5 = vector.extract_strided_slice %1 {offsets = [0, 0], sizes = [1, 1024], strides = [1, 1]} : vector<3x1024xf32> to vector<1x1024xf32>
    %6 = vector.broadcast %4 : vector<8x1xf32> to vector<8x1024xf32>
    %7 = vector.broadcast %5 : vector<1x1024xf32> to vector<8x1024xf32>
    %8 = arith.mulf %6, %7 : vector<8x1024xf32>
    %9 = vector.broadcast %3 : vector<8x1xf32> to vector<8x1024xf32>
    %10 = arith.addf %9, %8 : vector<8x1024xf32>
    %11 = vector.extract_strided_slice %2 {offsets = [0, 1], sizes = [8, 1], strides = [1, 1]} : vector<8x3xf32> to vector<8x1xf32>
    %12 = vector.extract_strided_slice %1 {offsets = [1, 0], sizes = [1, 1024], strides = [1, 1]} : vector<3x1024xf32> to vector<1x1024xf32>
    %13 = vector.broadcast %11 : vector<8x1xf32> to vector<8x1024xf32>
    %14 = vector.broadcast %12 : vector<1x1024xf32> to vector<8x1024xf32>
    %15 = arith.mulf %13, %14 : vector<8x1024xf32>
    %16 = arith.addf %10, %15 : vector<8x1024xf32>
    %17 = vector.extract_strided_slice %2 {offsets = [0, 2], sizes = [8, 1], strides = [1, 1]} : vector<8x3xf32> to vector<8x1xf32>
    %18 = vector.extract_strided_slice %1 {offsets = [2, 0], sizes = [1, 1024], strides = [1, 1]} : vector<3x1024xf32> to vector<1x1024xf32>
    %19 = vector.broadcast %17 : vector<8x1xf32> to vector<8x1024xf32>
    %20 = vector.broadcast %18 : vector<1x1024xf32> to vector<8x1024xf32>
    %21 = arith.mulf %19, %20 : vector<8x1024xf32>
    %22 = arith.addf %16, %21 : vector<8x1024xf32>
    %cst = arith.constant 0.000000e+00 : f32
    %23 = vector.broadcast %cst : f32 to vector<8x1024xf32>
    %24 = arith.maximumf %22, %23 : vector<8x1024xf32>
    %25 = arith.truncf %24 : vector<8x1024xf32> to vector<8x1024xbf16>
    %c0_6 = arith.constant 0 : index
    %c0_7 = arith.constant 0 : index
    %c0_8 = arith.constant 0 : index
    %26 = vector.load %arg5[%c0_6, %c0_7, %c0_8] : memref<1x8x1024xbf16, #tpu.memory_space<vmem>>, vector<1x8x1024xbf16>
    %27 = vector.shape_cast %26 : vector<1x8x1024xbf16> to vector<8x1024xbf16>
    %28 = vector.shape_cast %25 : vector<8x1024xbf16> to vector<1x8x1024xbf16>
    tpu.vector_store %arg5[%c0_6, %c0_7, %c0_8], %28 {strides = array<i32>} : memref<1x8x1024xbf16, #tpu.memory_space<vmem>>, vector<1x8x1024xbf16>,
    return
  }
  func.func @transform_0(%arg0: i32, %arg1: i32) -> (i32, i32, i32) {
    %c0_i32 = arith.constant 0 : i32
    %c0_i32_0 = arith.constant 0 : i32
    return %arg0, %c0_i32, %arg1 : i32, i32, i32
  }
  func.func @transform_1(%arg0: i32, %arg1: i32) -> (i32, i32) {
    %c0_i32 = arith.constant 0 : i32
    %c0_i32_0 = arith.constant 0 : i32
    %c0_i32_1 = arith.constant 0 : i32
    return %c0_i32, %c0_i32_0 : i32, i32
  }
  func.func @transform_2(%arg0: i32, %arg1: i32) -> (i32, i32) {
    %c0_i32 = arith.constant 0 : i32
    %c0_i32_0 = arith.constant 0 : i32
    %c0_i32_1 = arith.constant 0 : i32
    return %c0_i32, %c0_i32_0 : i32, i32
  }
  func.func @transform_3(%arg0: i32, %arg1: i32) -> (i32, i32, i32) {
    %c0_i32 = arith.constant 0 : i32
    %c0_i32_0 = arith.constant 0 : i32
    return %arg0, %c0_i32, %arg1 : i32, i32, i32
  }
}

</mosaic_0001>

<bundles_post_ra>
// kernel: tpu_custom_call.1
= control target key start
LH: loop header
LB: loop body
LE: loop exit
PB: predicated region body
PF: predicated region fallthrough
CT: control target
= control target key end

     0   :  { %8 = vsyncpa [#allocation3], 0  ;;  %s1057_s0 = inlined_call_operand.hbm [shape: f32[3,3,1024], index: 0, kind: input, shape index: {}]   ;;  %s1058_s1 = inlined_call_operand.vmem [shape: f32[8,3], index: 1, kind: input, shape index: {}]   ;;  %s1059_s2 = inlined_call_operand.vmem [shape: f32[8,1], index: 2, kind: input, shape index: {}]   ;;  %s1060_s3 = inlined_call_operand.hbm [shape: bf16[3,8,1024], index: 3, kind: output, shape index: {}]  }
   0x1   :  { %10 = vsyncpa [#allocation3 + $0x1], 0 }
   0x2   :  { %11 = vsyncpa [#allocation4], 0 }
   0x3   :  { %13 = vsyncpa [#allocation4 + $0x1], 0  ;;  %s877_s12 = smov 0   ;;  %s879_s13 = smov 0  }
   0x4   :  { %s881_s14 = smov 0   ;;  %s883_s15 = smov 0  }
   0x5   :  { %s885_s16 = smov 0   ;;  %s887_s17 = smov 0  }
   0x6 LB: > { %s644_s18 = sadd.s32 4294967295, %s850_s17   ;;  %s645_s19 = sadd.s32 4294967294, %s850_s17   ;;  %s850_s17 = sphi %s887_s17, %s19_s17   ;;  %s846_s16 = sphi %s885_s16, %s1075_s16   ;;  %s842_s15 = sphi %s883_s15, %s1074_s15   ;;  %s838_s14 = sphi %s881_s14, %s1073_s14   ;;  %s834_s13 = sphi %s879_s13, %s1072_s13   ;;  %s830_s12 = sphi %s877_s12, %s1071_s12  }
   0x7   : > { %s31_s20 = sadd.s32 1, %s846_s16  ;;  %s40_s21 = sadd.s32 1, %s838_s14 }
   0x8   : > { %p33_p0 = scmp.ge.s32.totalorder %s31_s20, 3  ;;  %p47_p1 = scmp.ne.s32.totalorder %s838_s14, %s834_s13 }
   0x9   : > { %p48_p2 = scmp.eq.s32.totalorder %s850_s17, 0  ;;  %p53_p3 = scmp.ne.s32.totalorder %s834_s13, %s830_s12 }
   0xa   : > { %s1077_s20 = smov (%p33_p0, %s31_s20), 0  ;;  %p54_p5 = scmp.eq.s32.totalorder %s644_s18, 0 }
   0xb   : > { %p918_p4 = por %p48_p2, %p47_p1  ;;  %s35_s23 = ssub.s32 %s846_s16, %s1077_s20 }
   0xc   : > { %p121_p6 = scmp.eq.s32.totalorder %s644_s18, 2  ;;  %p38_p7 = scmp.eq.s32.totalorder %s35_s23, 0 }
   0xd   : > { %p924_p8 = por %p54_p5, %p53_p3  ;;  %p127_p10 = scmp.eq.s32.totalorder %s645_s19, 2 }
   0xe   : > { %p928_p9 = por %p121_p6, %p47_p1  ;;  %p681_p12 = scmp.lt.s32.totalorder %s850_s17, 3 }
   0xf   : > { %s933_s26 = scalar_select %p38_p7, %s838_s14, %s40_s21  }
  0x10   : > { %s1064_s25 = scalar_select %p928_p9, 1, 0 }
  0x11   : > { %p935_p11 = por %p127_p10, %p53_p3  ;;  %s153_s28 = sand.u32 1, %s838_s14  }
  0x12   : > { %s648_s29 = sshll.u32 %s153_s28, 5  ;;  %s663_s30 = sshll.u32 %s846_s16, 9 }
  0x13   : > { %s1065_s27 = scalar_select %p935_p11, 1, 0 }
  0x14   : > { %s945_s6 = scalar_lea.hbm %s1057_s0, %s663_s30  ;;  %s157_s7 = scalar_lea.vmem [#allocation2], %s648_s29 }
  0x15   : > { %s167_s8 = sshll.u32 %s157_s7, 4  ;;  %p951_p13 = pnand %p681_p12, %p918_p4  ;;  %s947_s8 = int_to_ptr.vmem [resolvable:$true] %s167_s8 }
  0x16   : > { %s154_s10 = scalar_lea.sflag [#allocation3], %s153_s28  ;;  %s738_s11 = scalar_lea.hbm %s945_s6, 512 }
  0x17   : > { %p739_p2 = scmp.ne.s32.totalorder %s945_s6, %s738_s11  ;;  %p740_p3 = pneg %p951_p13 }
  0x18   : > { %s743_s21 = scalar_lea.hbm %s1057_s0, 1536  ;;  %p744_p4 = scmp.lt.u32.totalorder %s945_s6, %s1057_s0 }
  0x19   : > { %p741_p5 = pnand %p740_p3, %p739_p2  ;;  %p745_p7 = scmp.lt.u32.totalorder %s743_s21, %s738_s11 }
  0x1a   : > { %p747_p12 = scmp.lt.u32.totalorder %s738_s11, %s945_s6 }
  0x1b   : > { %p742_p6 = pneg %p741_p5  ;;  %p746_p10 = por %p745_p7, %p744_p4 }
  0x1d   : > { %p748_p0 = por %p747_p12, %p746_p10 }
  0x1f   : > { %p749_p1 = pnand %p748_p0, %p742_p6 }
  0x21   : > { %752 = shalt.err (!%p749_p1)
}
  0x22   : > { %s753_s28 = scalar_lea.vmem %s947_s8, 512  ;;  %s852_s29 = smov [#allocation2]  }
  0x23   : > { %p754_p2 = scmp.ne.s32.totalorder %s947_s8, %s753_s28  ;;  %s758_s30 = sshll.u32 %s852_s29, 4  ;;  %s759_s30 = int_to_ptr.vmem [resolvable:$false] %s758_s30 }
  0x24   : > { %s760_s4 = scalar_lea.vmem %s759_s30, 1024  ;;  %p761_p9 = scmp.lt.s32.totalorder %s947_s8, %s759_s30 }
  0x25   : > { %p756_p5 = pnand %p754_p2, %p740_p3  ;;  %p762_p4 = scmp.lt.s32.totalorder %s760_s4, %s753_s28 }
  0x27   : > { %p757_p11 = pneg %p756_p5  ;;  %p763_p7 = por %p762_p4, %p761_p9 }
  0x29   : > { %p764_p10 = pnand %p763_p7, %p757_p11 }
  0x2b   : > { %767 = shalt.err (!%p764_p10)
}
  0x2c   : > { %676 = dma.hbm_to_vmem [thread:$0]  (!%p951_p13), %s945_s6, 512, %s947_s8, %s154_s10  }
  0x2d   : > { %p1067_p0 = scmp.lt.s32.totalorder %s850_s17, 4  ;;  %p1068_p1 = scmp.ge.s32.totalorder %s850_s17, 1 }
  0x2f   : > { %p173_p3 = pnand %p1068_p1, %p1067_p0 }
  0x30   : > { %s987_s5 = sand.u32 (!%p173_p3), 1, %s834_s13  }
  0x31   : > { %176 = sbr.rel (%p173_p3) target bundleno = 218 (0xda), region = 32  ;;  %s652_s7 = sshll.u32 (!%p173_p3), %s987_s5, 5 }
  0x32   : > { %s179_s11 = scalar_lea.sflag (!%p173_p3), [#allocation3], %s987_s5  ;;  %s182_s9 = scalar_lea.vmem (!%p173_p3), [#allocation2], %s652_s7 }
  0x38   : > { %821 = dma.done.wait (%p924_p8), %s179_s11, 512  }
  0x39   : > { %823 = vsyncadd (%p924_p8), %s179_s11, 4294966784  ;;  %v853_v0 = vmov 0   ;;  %v854_v1 = vmov 1   ;;  %v211_v2 = vld [vmem:[%s1058_s1] sm:$0xff]  ;;  %v855_v4 = vmov 2   ;;  %v222_v5 = vlaneseq  ;;  %s668_s24 = sshll.u32 %s842_s15, 9 }
  0x3a   : > { %734 = vset.pattern.permute.xlu0 %v853_v0  ;;  %735 = vset.pattern.permute.xlu1 %v854_v1  ;;  %v212_v3 = vld [vmem:[%s1059_s2] sm:$0xff]  ;;  %v208_v10 = vld [vmem:[%s182_s9 + $0x8] sm:$0x77]  ;;  %v209_v11 = vld [vmem:[%s182_s9 + $0x10] sm:$0x77]  ;;  %s204_s19 = scalar_lea.vmem [#allocation5], %s652_s7  ;;  %s1009_s28 = scalar_lea.hbm %s1060_s3, %s668_s24 }
  0x3b   : > { %215 = vperm.xlu0 %734, %v211_v2   ;;  %316 = vperm.xlu1 %735, %v211_v2   ;;  %v223_v6 = vshrl.u32 %v222_v5, 7  ;;  %v207_v9 = vld [vmem:[%s182_s9] sm:$0x77]  ;;  %v210_v12 = vld [vmem:[%s182_s9 + $0x18] sm:$0x77]  ;;  %s560_s21 = sshll.u32 %s204_s19, 4  ;;  %s1011_s21 = int_to_ptr.vmem [resolvable:$true] %s560_s21 }
  0x3c   : > { %s544_s15 = scalar_lea.sflag [#allocation4], %s987_s5  ;;  %s768_s29 = scalar_lea.vmem %s1011_s21, 512 }
  0x3d   : > { %v224_v7 = vsub.s32 0, %v223_v6  ;;  %v228_v8 = vsub.s32 4, %v223_v6  ;;  %v321_v13 = vsub.s32 1, %v223_v6  ;;  %v325_v21 = vsub.s32 5, %v223_v6  ;;  %p769_p8 = scmp.ne.s32.totalorder %s1011_s21, %s768_s29  ;;  %p1069_p9 = scmp.ne.s32.totalorder %s1064_s25, 0 }
  0x3e   : > { %v413_v23 = vsub.s32 2, %v223_v6  ;;  %v417_v28 = vsub.s32 6, %v223_v6  ;;  %s856_s30 = smov [#allocation5]  }
  0x3f   : > { %304 = vperm.xlu0 %734, %v212_v3   ;;  %736 = vset.pattern.permute.xlu1 %v855_v4  ;;  %v225_v14 = vrot.slane %v207_v9, %v224_v7  ;;  %v229_v15 = vrot.slane %v207_v9, %v228_v8  ;;  %v233_v16 = vrot.slane %v208_v10, %v224_v7  ;;  %p770_p11 = pnand %p769_p8, %p1069_p9  ;;  %s772_s4 = sshll.u32 %s856_s30, 4  ;;  %s773_s4 = int_to_ptr.vmem [resolvable:$false] %s772_s4 }
  0x40   : > { %408 = vperm.xlu1 %736, %v211_v2   ;;  %v237_v17 = vrot.slane %v208_v10, %v228_v8  ;;  %v241_v18 = vrot.slane %v209_v11, %v224_v7  ;;  %v245_v19 = vrot.slane %v209_v11, %v228_v8  ;;  %v249_v20 = vrot.slane %v210_v12, %v224_v7  ;;  %s774_s7 = scalar_lea.vmem %s773_s4, 1024  ;;  %p775_p6 = scmp.lt.s32.totalorder %s1011_s21, %s773_s4 }
  0x41   : > { %v253_v22 = vrot.slane %v210_v12, %v228_v8  ;;  %v322_v24 = vrot.slane %v207_v9, %v321_v13  ;;  %v265_v25 = vrot.slane %v225_v14, %v224_v7  ;;  %v269_v26 = vrot.slane %v229_v15, %v224_v7  ;;  %p771_p13 = pneg %p770_p11  ;;  %p776_p12 = scmp.lt.s32.totalorder %s774_s7, %s768_s29 }
  0x42   : > { %v273_v27 = vrot.slane %v233_v16, %v224_v7  ;;  %v277_v29 = vrot.slane %v237_v17, %v224_v7  ;;  %v281_v30 = vrot.slane %v241_v18, %v224_v7  ;;  %v285_v31 = vrot.slane %v245_v19, %v224_v7 }
  0x43   : > { %737 = vset.pattern.permute.xlu0 %v855_v4  ;;  %v289_v32 = vrot.slane %v249_v20, %v224_v7  ;;  %v293_v33 = vrot.slane %v253_v22, %v224_v7  ;;  %v326_v34 = vrot.slane %v207_v9, %v325_v21  ;;  %v330_v35 = vrot.slane %v208_v10, %v321_v13  ;;  %p777_p2 = por %p776_p12, %p775_p6 }
  0x44   : > { %v334_v36 = vrot.slane %v208_v10, %v325_v21  ;;  %v338_v37 = vrot.slane %v209_v11, %v321_v13  ;;  %v342_v38 = vrot.slane %v209_v11, %v325_v21  ;;  %v346_v39 = vrot.slane %v210_v12, %v321_v13 }
  0x45   : > { %v350_v40 = vrot.slane %v210_v12, %v325_v21  ;;  %v414_v41 = vrot.slane %v207_v9, %v413_v23  ;;  %v418_v42 = vrot.slane %v207_v9, %v417_v28  ;;  %v422_v43 = vrot.slane %v208_v10, %v413_v23  ;;  %p778_p5 = pnand %p777_p2, %p771_p13 }
  0x46   : > { %v426_v44 = vrot.slane %v208_v10, %v417_v28  ;;  %v430_v45 = vrot.slane %v209_v11, %v413_v23  ;;  %v434_v46 = vrot.slane %v209_v11, %v417_v28  ;;  %v438_v47 = vrot.slane %v210_v12, %v413_v23 }
  0x47   : > { %v442_v48 = vrot.slane %v210_v12, %v417_v28  ;;  %v362_v49 = vrot.slane %v322_v24, %v321_v13  ;;  %v366_v50 = vrot.slane %v326_v34, %v321_v13  ;;  %v370_v51 = vrot.slane %v330_v35, %v321_v13 }
  0x48   : > { %v374_v52 = vrot.slane %v334_v36, %v321_v13  ;;  %v378_v53 = vrot.slane %v338_v37, %v321_v13  ;;  %v382_v54 = vrot.slane %v342_v38, %v321_v13  ;;  %v386_v55 = vrot.slane %v346_v39, %v321_v13 }
  0x49   : > { %v390_v56 = vrot.slane %v350_v40, %v321_v13  ;;  %v454_v57 = vrot.slane %v414_v41, %v413_v23  ;;  %v458_v58 = vrot.slane %v418_v42, %v413_v23  ;;  %v462_v59 = vrot.slane %v422_v43, %v413_v23 }
  0x4a   : > { %v466_v60 = vrot.slane %v426_v44, %v413_v23  ;;  %v470_v63 = vrot.slane %v430_v45, %v413_v23  ;;  %v474_v0 = vrot.slane %v434_v46, %v413_v23  ;;  %v478_v1 = vrot.slane %v438_v47, %v413_v23 }
  0x4b   : > { %v482_v2 = vrot.slane %v442_v48, %v413_v23 }
  0xba   : > { %v216_v61 = vpop.permute.xlu0 %215  ;;  %v317_v62 = vpop.permute.xlu1 %316 }
  0xbb   : > { %v294_v3 = vmul.f32 %v265_v25, %v216_v61  ;;  %v295_v4 = vmul.f32 %v269_v26, %v216_v61  ;;  %v296_v5 = vmul.f32 %v273_v27, %v216_v61  ;;  %v297_v6 = vmul.f32 %v277_v29, %v216_v61 }
  0xbc   : > { %v298_v7 = vmul.f32 %v281_v30, %v216_v61  ;;  %v299_v8 = vmul.f32 %v285_v31, %v216_v61  ;;  %v300_v9 = vmul.f32 %v289_v32, %v216_v61  ;;  %v301_v10 = vmul.f32 %v293_v33, %v216_v61 }
  0xbd   : > { %v391_v11 = vmul.f32 %v362_v49, %v317_v62  ;;  %v392_v12 = vmul.f32 %v366_v50, %v317_v62  ;;  %v393_v13 = vmul.f32 %v370_v51, %v317_v62  ;;  %v394_v14 = vmul.f32 %v374_v52, %v317_v62 }
  0xbe   : > { %v305_v15 = vpop.permute.xlu0 %304  ;;  %v395_v16 = vmul.f32 %v378_v53, %v317_v62  ;;  %v396_v17 = vmul.f32 %v382_v54, %v317_v62  ;;  %v397_v18 = vmul.f32 %v386_v55, %v317_v62  ;;  %v398_v19 = vmul.f32 %v390_v56, %v317_v62 }
  0xbf   : > { %v307_v20 = vadd.f32 %v305_v15, %v294_v3  ;;  %v308_v21 = vadd.f32 %v305_v15, %v295_v4  ;;  %v309_v22 = vadd.f32 %v305_v15, %v296_v5  ;;  %v310_v23 = vadd.f32 %v305_v15, %v297_v6  ;;  %v409_v28 = vpop.permute.xlu1 %408 }
  0xc0   : > { %v311_v24 = vadd.f32 %v305_v15, %v298_v7  ;;  %v312_v25 = vadd.f32 %v305_v15, %v299_v8  ;;  %v313_v26 = vadd.f32 %v305_v15, %v300_v9  ;;  %v314_v27 = vadd.f32 %v305_v15, %v301_v10 }
  0xc1   : > { %v399_v29 = vadd.f32 %v391_v11, %v307_v20  ;;  %v400_v30 = vadd.f32 %v392_v12, %v308_v21  ;;  %v401_v31 = vadd.f32 %v393_v13, %v309_v22  ;;  %v402_v32 = vadd.f32 %v394_v14, %v310_v23 }
  0xc2   : > { %v403_v33 = vadd.f32 %v395_v16, %v311_v24  ;;  %v404_v34 = vadd.f32 %v396_v17, %v312_v25  ;;  %v405_v35 = vadd.f32 %v397_v18, %v313_v26  ;;  %v406_v36 = vadd.f32 %v398_v19, %v314_v27 }
  0xc3   : > { %v483_v37 = vmul.f32 %v454_v57, %v409_v28  ;;  %v484_v38 = vmul.f32 %v458_v58, %v409_v28  ;;  %v485_v39 = vmul.f32 %v462_v59, %v409_v28  ;;  %v486_v40 = vmul.f32 %v466_v60, %v409_v28 }
  0xc4   : > { %v487_v41 = vmul.f32 %v470_v63, %v409_v28  ;;  %v488_v42 = vmul.f32 %v474_v0, %v409_v28  ;;  %v489_v43 = vmul.f32 %v478_v1, %v409_v28  ;;  %v490_v44 = vmul.f32 %v482_v2, %v409_v28 }
  0xc5   : > { %v491_v45 = vadd.f32 %v483_v37, %v399_v29  ;;  %v492_v46 = vadd.f32 %v484_v38, %v400_v30  ;;  %v493_v47 = vadd.f32 %v485_v39, %v401_v31  ;;  %v494_v48 = vadd.f32 %v486_v40, %v402_v32 }
  0xc6   : > { %v495_v49 = vadd.f32 %v487_v41, %v403_v33  ;;  %v496_v50 = vadd.f32 %v488_v42, %v404_v34  ;;  %v497_v51 = vadd.f32 %v489_v43, %v405_v35  ;;  %v498_v52 = vadd.f32 %v490_v44, %v406_v36 }
  0xc7   : > { %v499_v53 = vmax.f32 %v491_v45, 0.0  ;;  %v500_v54 = vmax.f32 %v492_v46, 0.0  ;;  %v501_v55 = vmax.f32 %v493_v47, 0.0  ;;  %v502_v56 = vmax.f32 %v494_v48, 0.0 }
  0xc8   : > { %v503_v57 = vmax.f32 %v495_v49, 0.0  ;;  %v504_v58 = vmax.f32 %v496_v50, 0.0  ;;  %v505_v59 = vmax.f32 %v497_v51, 0.0  ;;  %v506_v60 = vmax.f32 %v498_v52, 0.0 }
  0xc9   : > { %v664_v61 = vpack.c.bf16 %v500_v54, %v499_v53  ;;  %v665_v62 = vpack.c.bf16 %v502_v56, %v501_v55 }
  0xca   : > { %v666_v63 = vpack.c.bf16 %v504_v58, %v503_v57  ;;  %v667_v0 = vpack.c.bf16 %v506_v60, %v505_v59 }
  0xcb   : > { %539 = vst [vmem:[%s204_s19] sm:$0xff] %v664_v61  ;;  %540 = vst [vmem:[%s204_s19 + $0x8] sm:$0xff] %v665_v62 }
  0xcc   : > { %541 = vst [vmem:[%s204_s19 + $0x10] sm:$0xff] %v666_v63  ;;  %542 = vst [vmem:[%s204_s19 + $0x18] sm:$0xff] %v667_v0 }
  0xcd   : > { %781 = shalt.err (!%p778_p5)
}
  0xce   : > { %s782_s5 = scalar_lea.hbm %s1009_s28, 512  ;;  %s786_s6 = scalar_lea.hbm %s1060_s3, 1536 }
  0xcf   : > { %p783_p4 = scmp.ne.s32.totalorder %s1009_s28, %s782_s5  ;;  %p787_p0 = scmp.lt.u32.totalorder %s1009_s28, %s1060_s3 }
  0xd0   : > { %p788_p1 = scmp.lt.u32.totalorder %s786_s6, %s782_s5  ;;  %p790_p8 = scmp.lt.u32.totalorder %s782_s5, %s1009_s28 }
  0xd1   : > { %p784_p7 = pnand %p783_p4, %p1069_p9 }
  0xd2   : > { %p789_p3 = por %p788_p1, %p787_p0 }
  0xd3   : > { %p785_p10 = pneg %p784_p7 }
  0xd4   : > { %p791_p11 = por %p790_p8, %p789_p3 }
  0xd6   : > { %p792_p13 = pnand %p791_p11, %p785_p10 }
  0xd8   : > { %795 = shalt.err (!%p792_p13)
}
  0xd9   : > { %671 = dma.vmem_to_hbm [thread:$0]  (%p1069_p9), %s1011_s21, 512, %s1009_s28, %s544_s15  }
  0xda PF: > { %p682_p6 = scmp.ge.s32.totalorder %s850_s17, 2  ;;  %s572_s18 = sand.u32 1, %s830_s12  }
  0xdb   : > { %p1070_p12 = scmp.ne.s32.totalorder %s1065_s27, 0  ;;  %s573_s24 = scalar_lea.sflag [#allocation4], %s572_s18 }
  0xdd   : > { %p678_p2 = pnand %p682_p6, %p1070_p12 }
  0xdf   : > { %825 = dma.done.wait (!%p678_p2), %s573_s24, 512  }
  0xe0   : > { %827 = vsyncadd (!%p678_p2), %s573_s24, 4294966784  ;;  %s19_s17 = sadd.s32 1, %s850_s17   ;;  %s1071_s12 = smov %s834_s13 }
  0xe1   : > { %p16_p5 = scmp.ge.s32.totalorder %s19_s17, 5   ;;  %s1072_s13 = smov %s838_s14 }
  0xe2   : > { %s1073_s14 = smov %s933_s26  ;;  %s1074_s15 = smov %s846_s16 }
  0xe3   : > { %s1075_s16 = smov %s1077_s20  ;;  %18 = sbr.rel (!%p16_p5) target bundleno = 6 (0x6), region = 77 }
  0xea   :  { %578 = vsyncpa [#allocation3], 1 }
  0xeb   :  { %580 = vsyncpa [#allocation3 + $0x1], 1 }
  0xec   :  { %581 = vsyncpa [#allocation4], 1 }
  0xed   :  { %583 = vsyncpa [#allocation4 + $0x1], 1 }

</bundles_post_ra>
